<compile_context>
chip_gen: v7x
topology: tpu7x:2x2x1
jax: 0.10.0
libtpu: 0.0.40
codegen_flags: <defaults>
</compile_context>

<pallas_src>
import functools

import jax
import jax.numpy as jnp
from jax.experimental import pallas as pl
from jax.experimental.pallas import tpu as pltpu

LANE = 128
SUBL = 16          # sublane granularity that is packed-tile clean for f32 and bf16


def _default_num_partials():
    # Use a 2-way partial-sum axis only on chips with two TensorCores per device
    # (v7x, megacore v4/v5p).  Single-TC v5e/v6e keep a size-1 axis (pure overhead
    # otherwise).  Correctness is independent of this choice.
    try:
        kind = jax.devices()[0].device_kind.lower()
    except Exception:
        return 1
    if ("v7" in kind) or ("7x" in kind) or ("v4" in kind) or ("v5p" in kind):
        return 2
    return 1


def _loss_kernel(ts_ref, es_ref, tl_ref, el_ref, out_ref, acc_ref, *,
                 lam, inv_n_series, inv_n_label, rows_valid, tile_rows,
                 tiles_per_part):
    c = pl.program_id(0)               # partial-sum index (TC shard on 2-TC chips)
    i = pl.program_id(1)               # row-tile index (sequential reduction)

    @pl.when(i == 0)
    def _init():
        acc_ref[...] = jnp.zeros_like(acc_ref)

    # Logical (unclamped) base row of this tile.  The index_map clamps the DMA to an
    # in-bounds block; masking below zeroes any rows at or beyond rows_valid, so
    # ragged last tiles and duplicated "overflow" iterations contribute exactly 0.
    base = (c * tiles_per_part + i) * tile_rows

    def _accumulate(masked):
        d = es_ref[...].astype(jnp.float32) - ts_ref[...].astype(jnp.float32)
        sq = d * d
        if masked:
            row_id = jax.lax.broadcasted_iota(jnp.int32, sq.shape, 0)
            sq = jnp.where(row_id < (rows_valid - base), sq, 0.0)
        if tile_rows % 8 == 0:
            # vreg-shaped accumulation: pure VPU vreg adds, no per-step XLU reduce.
            acc_ref[...] += sq.reshape(tile_rows // 8, 8, LANE).sum(axis=0)
        else:
            # tiny single-tile fallback (rows < 16): one small sublane reduce.
            acc_ref[0:1, :] += jnp.sum(sq, axis=0, keepdims=True)

    full = base + tile_rows <= rows_valid

    @pl.when(full)
    def _full_tile():
        _accumulate(False)

    @pl.when(jnp.logical_not(full))
    def _ragged_tile():
        _accumulate(True)

    last = pl.num_programs(1) - 1

    @pl.when(jnp.logical_and(i == last, c == 0))
    def _finalize_with_bce():
        mse_part = jnp.sum(acc_ref[...]) * jnp.float32(inv_n_series)
        # BCE on the tiny resident label block, only on the c == 0 partial.
        # Zero-padded entries (p=0, t=0) contribute exactly 0 thanks to the -100
        # log clamp (keep the clamp applied before the multiply).
        p = el_ref[...].astype(jnp.float32)
        t = tl_ref[...].astype(jnp.float32)
        log_p = jnp.maximum(jnp.log(p), -100.0)
        log_1mp = jnp.maximum(jnp.log(1.0 - p), -100.0)
        bce_sum = jnp.sum(-(t * log_p + (1.0 - t) * log_1mp))
        out_ref[0, 0] = mse_part + jnp.float32(lam * inv_n_label) * bce_sum

    @pl.when(jnp.logical_and(i == last, c != 0))
    def _finalize_mse_only():
        out_ref[0, 0] = jnp.sum(acc_ref[...]) * jnp.float32(inv_n_series)


def custom_loss(target_series, est_series, target_label, est_label, *, lam,
                tile_rows=8192, num_partials=None):
    n_series = int(target_series.size)
    n_label = int(target_label.size)

    if num_partials is None:
        num_partials = _default_num_partials()

    # --- lane-dense series slab.  Common case (n_series % 128 == 0): pure metadata
    # reshape, no HBM copy.  Otherwise pad the flat tail up to a multiple of 128
    # (zero pad contributes 0 to the squared-diff sum).
    if n_series % LANE == 0:
        rows = n_series // LANE

        def to_slab(x):
            return x.reshape(rows, LANE)            # no-copy reshape
    else:
        # TODO(synk): non-128-divisible series still pays one padded HBM copy.
        rows = int(pl.cdiv(n_series, LANE))

        def to_slab(x):
            flat = x.reshape(-1)
            return jnp.pad(flat, (0, rows * LANE - n_series)).reshape(rows, LANE)

    ts = to_slab(target_series)
    es = to_slab(est_series)

    # --- tile sizing: large streamed tiles (amortize per-step overhead), rounded to
    # 16 sublanes so bf16 inputs keep clean packed tiles.
    tr = min(int(tile_rows), int(pl.cdiv(rows, num_partials)))
    tr = ((tr + SUBL - 1) // SUBL) * SUBL
    if tr >= rows:
        tr = rows                 # single full-extent block: exact, nothing masked
        num_partials = 1
    n_tiles_total = int(pl.cdiv(rows, tr))
    tiles_per_part = int(pl.cdiv(n_tiles_total, num_partials))
    last_block = n_tiles_total - 1

    def series_map(c, i):
        # Clamp so "extra" iterations of a ragged split re-read the last in-bounds
        # block; the kernel masks their contribution to exactly zero.
        return (jnp.minimum(c * tiles_per_part + i, last_block), 0)

    # --- tiny, resident, lane-dense label slab (DMA'd once; constant index_map).
    lbl_rows = max(1, int(pl.cdiv(n_label, LANE)))

    def to_label_slab(x):
        flat = x.reshape(-1)
        return jnp.pad(flat, (0, lbl_rows * LANE - flat.size)).reshape(lbl_rows, LANE)

    tl = to_label_slab(target_label)
    el = to_label_slab(est_label)

    kernel = functools.partial(
        _loss_kernel,
        lam=float(lam),
        inv_n_series=1.0 / float(n_series),
        inv_n_label=1.0 / float(n_label),
        rows_valid=rows,
        tile_rows=tr,
        tiles_per_part=tiles_per_part,
    )

    cost = pl.CostEstimate(
        flops=3 * n_series + 6 * n_label,
        transcendentals=2 * n_label,
        bytes_accessed=int(ts.nbytes + es.nbytes + tl.nbytes + el.nbytes
                           + 4 * num_partials),
    )

    partials = pl.pallas_call(
        kernel,
        out_shape=jax.ShapeDtypeStruct((num_partials, 1), jnp.float32),
        grid=(num_partials, tiles_per_part),
        in_specs=[
            pl.BlockSpec((tr, LANE), series_map),
            pl.BlockSpec((tr, LANE), series_map),
            pl.BlockSpec((lbl_rows, LANE), lambda c, i: (0, 0)),
            pl.BlockSpec((lbl_rows, LANE), lambda c, i: (0, 0)),
        ],
        out_specs=pl.BlockSpec((1, 1), lambda c, i: (c, 0),
                               memory_space=pltpu.SMEM),
        scratch_shapes=[pltpu.VMEM((8, LANE), jnp.float32)],
        compiler_params=pltpu.CompilerParams(
            dimension_semantics=("parallel", "arbitrary"),
            vmem_limit_bytes=32 << 20,
        ),
        cost_estimate=cost,
    )(ts, es, tl, el)

    return jnp.sum(partials)


def _reference(target_series, est_series, target_label, est_label, lam):
    mse = jnp.mean((est_series.astype(jnp.float32)
                    - target_series.astype(jnp.float32)) ** 2)
    p = est_label.astype(jnp.float32)
    t = target_label.astype(jnp.float32)
    bce = jnp.mean(
        -(t * jnp.maximum(jnp.log(p), -100.0)
          + (1.0 - t) * jnp.maximum(jnp.log(1.0 - p), -100.0)))
    return mse + lam * bce


if __name__ == "__main__":
    key = jax.random.PRNGKey(0)
    k1, k2, k3, k4, k5, k6, k7, k8 = jax.random.split(key, 8)

    # --- case 1: small shapes matching the module's intent (batch=2, seq=8, hidden=32).
    B, T, D = 2, 8, 32
    L = 1
    target_series = jax.random.normal(k1, (B, T, D), dtype=jnp.float32)
    est_series = jax.random.normal(k2, (B, T, D), dtype=jnp.float32)
    target_label = jax.random.bernoulli(k3, 0.5, (B, L)).astype(jnp.float32)
    est_label = jax.nn.sigmoid(jax.random.normal(k4, (B, L), dtype=jnp.float32))
    lam = 0.5

    out = custom_loss(target_series, est_series, target_label, est_label, lam=lam)
    out = jax.block_until_ready(out)
    ref = _reference(target_series, est_series, target_label, est_label, lam)
    assert jnp.allclose(out, ref, rtol=1e-5, atol=1e-5), (out, ref)

    # --- case 2: exercises multi-tile grid, 2-way partials, ragged-tile masking and
    # the clamped overflow block (still small: 4x25x128 series, 12 labels).
    ts2 = jax.random.normal(k5, (4, 25, 128), dtype=jnp.float32)
    es2 = jax.random.normal(k6, (4, 25, 128), dtype=jnp.float32)
    tl2 = jax.random.bernoulli(k7, 0.5, (4, 3)).astype(jnp.float32)
    el2 = jax.nn.sigmoid(jax.random.normal(k8, (4, 3), dtype=jnp.float32))

    out2 = custom_loss(ts2, es2, tl2, el2, lam=0.7, tile_rows=48, num_partials=2)
    out2 = jax.block_until_ready(out2)
    ref2 = _reference(ts2, es2, tl2, el2, 0.7)
    assert jnp.allclose(out2, ref2, rtol=1e-5, atol=1e-5), (out2, ref2)

    print("KERNEL_OK")
</pallas_src>

<mosaic_0001>
module attributes {stable_mosaic.version = 11 : i64} {
  func.func @_loss_kernel(%arg0: i32, %arg1: i32, %arg2: memref<4x128xf32, #tpu.memory_space<vmem>>, %arg3: memref<4x128xf32, #tpu.memory_space<vmem>>, %arg4: memref<1x128xf32, #tpu.memory_space<vmem>>, %arg5: memref<1x128xf32, #tpu.memory_space<vmem>>, %arg6: memref<1x1xf32, #tpu.memory_space<smem>>, %arg7: memref<8x128xf32, #tpu.memory_space<vmem>>) attributes {dimension_semantics = [#tpu.dimension_semantics<parallel>, #tpu.dimension_semantics<arbitrary>], iteration_bounds = array<i64: 1, 1>, scalar_prefetch = 0 : i64, scratch_operands = 1 : i64, tpu.core_type = #tpu.core_type<tc>, window_params = [{transform_indices = @transform_0, window_bounds = array<i64: 4, 128>}, {transform_indices = @transform_1, window_bounds = array<i64: 4, 128>}, {pipeline_mode = #tpu.pipeline_mode<synchronous>, transform_indices = @transform_2, window_bounds = array<i64: 1, 128>}, {pipeline_mode = #tpu.pipeline_mode<synchronous>, transform_indices = @transform_3, window_bounds = array<i64: 1, 128>}, {transform_indices = @transform_4, window_bounds = array<i64: 1, 1>}]} {
    %c0_i32 = arith.constant 0 : i32
    %0 = arith.cmpi eq, %arg1, %c0_i32 : i32
    %1 = arith.extui %0 : i1 to i32
    %c0_i32_0 = arith.constant 0 : i32
    %2 = arith.cmpi ne, %1, %c0_i32_0 : i32
    scf.if %2 {
      %cst = arith.constant 0.000000e+00 : f32
      %23 = vector.broadcast %cst : f32 to vector<8x128xf32>
      %c0 = arith.constant 0 : index
      %c0_11 = arith.constant 0 : index
      %24 = vector.load %arg7[%c0, %c0_11] : memref<8x128xf32, #tpu.memory_space<vmem>>, vector<8x128xf32>
      tpu.vector_store %arg7[%c0, %c0_11], %23 {strides = array<i32>} : memref<8x128xf32, #tpu.memory_space<vmem>>, vector<8x128xf32>,
    } else {
    }
    %c1_i32 = arith.constant 1 : i32
    %3 = arith.muli %arg0, %c1_i32 : i32
    %4 = arith.addi %3, %arg1 : i32
    %c4_i32 = arith.constant 4 : i32
    %5 = arith.muli %4, %c4_i32 : i32
    %c4_i32_1 = arith.constant 4 : i32
    %6 = arith.addi %5, %c4_i32_1 : i32
    %c4_i32_2 = arith.constant 4 : i32
    %7 = arith.cmpi sle, %6, %c4_i32_2 : i32
    %8 = arith.extui %7 : i1 to i32
    %c0_i32_3 = arith.constant 0 : i32
    %9 = arith.cmpi ne, %8, %c0_i32_3 : i32
    scf.if %9 {
      %c0 = arith.constant 0 : index
      %c0_11 = arith.constant 0 : index
      %23 = vector.load %arg3[%c0, %c0_11] : memref<4x128xf32, #tpu.memory_space<vmem>>, vector<4x128xf32>
      %c0_12 = arith.constant 0 : index
      %c0_13 = arith.constant 0 : index
      %24 = vector.load %arg2[%c0_12, %c0_13] : memref<4x128xf32, #tpu.memory_space<vmem>>, vector<4x128xf32>
      %25 = arith.subf %23, %24 : vector<4x128xf32>
      %26 = arith.mulf %25, %25 : vector<4x128xf32>
      %c0_14 = arith.constant 0 : index
      %c0_15 = arith.constant 0 : index
      %27 = vector.load %arg7[%c0_14, %c0_15] : memref<8x128xf32, #tpu.memory_space<vmem>>, vector<1x128xf32>
      %cst = arith.constant dense<0.000000e+00> : vector<128xf32>
      %28 = vector.multi_reduction <add>, %26, %cst [0] : vector<4x128xf32> to vector<128xf32>
      %29 = vector.shape_cast %28 : vector<128xf32> to vector<1x128xf32>
      %30 = arith.addf %27, %29 : vector<1x128xf32>
      %c0_16 = arith.constant 0 : index
      %c0_17 = arith.constant 0 : index
      %31 = vector.load %arg7[%c0_16, %c0_17] : memref<8x128xf32, #tpu.memory_space<vmem>>, vector<1x128xf32>
      tpu.vector_store %arg7[%c0_16, %c0_17], %30 {strides = array<i32>} : memref<8x128xf32, #tpu.memory_space<vmem>>, vector<1x128xf32>,
    } else {
    }
    %true = arith.constant true
    %10 = arith.xori %7, %true : i1
    %11 = arith.extui %10 : i1 to i32
    %c0_i32_4 = arith.constant 0 : i32
    %12 = arith.cmpi ne, %11, %c0_i32_4 : i32
    scf.if %12 {
      %c0 = arith.constant 0 : index
      %c0_11 = arith.constant 0 : index
      %23 = vector.load %arg3[%c0, %c0_11] : memref<4x128xf32, #tpu.memory_space<vmem>>, vector<4x128xf32>
      %c0_12 = arith.constant 0 : index
      %c0_13 = arith.constant 0 : index
      %24 = vector.load %arg2[%c0_12, %c0_13] : memref<4x128xf32, #tpu.memory_space<vmem>>, vector<4x128xf32>
      %25 = arith.subf %23, %24 : vector<4x128xf32>
      %26 = arith.mulf %25, %25 : vector<4x128xf32>
      %27 = tpu.iota {dimensions = array<i32: 0>} : vector<4x128xi32>
      %c4_i32_14 = arith.constant 4 : i32
      %28 = arith.subi %c4_i32_14, %5 : i32
      %29 = vector.broadcast %28 : i32 to vector<4x128xi32>
      %30 = arith.cmpi slt, %27, %29 : vector<4x128xi32>
      %cst = arith.constant 0.000000e+00 : f32
      %31 = vector.broadcast %cst : f32 to vector<4x128xf32>
      %32 = arith.select %30, %26, %31 : vector<4x128xi1>, vector<4x128xf32>
      %c0_15 = arith.constant 0 : index
      %c0_16 = arith.constant 0 : index
      %33 = vector.load %arg7[%c0_15, %c0_16] : memref<8x128xf32, #tpu.memory_space<vmem>>, vector<1x128xf32>
      %cst_17 = arith.constant dense<0.000000e+00> : vector<128xf32>
      %34 = vector.multi_reduction <add>, %32, %cst_17 [0] : vector<4x128xf32> to vector<128xf32>
      %35 = vector.shape_cast %34 : vector<128xf32> to vector<1x128xf32>
      %36 = arith.addf %33, %35 : vector<1x128xf32>
      %c0_18 = arith.constant 0 : index
      %c0_19 = arith.constant 0 : index
      %37 = vector.load %arg7[%c0_18, %c0_19] : memref<8x128xf32, #tpu.memory_space<vmem>>, vector<1x128xf32>
      tpu.vector_store %arg7[%c0_18, %c0_19], %36 {strides = array<i32>} : memref<8x128xf32, #tpu.memory_space<vmem>>, vector<1x128xf32>,
    } else {
    }
    %c0_i32_5 = arith.constant 0 : i32
    %13 = arith.cmpi eq, %arg1, %c0_i32_5 : i32
    %c0_i32_6 = arith.constant 0 : i32
    %14 = arith.cmpi eq, %arg0, %c0_i32_6 : i32
    %15 = arith.andi %13, %14 : i1
    %16 = arith.extui %15 : i1 to i32
    %c0_i32_7 = arith.constant 0 : i32
    %17 = arith.cmpi ne, %16, %c0_i32_7 : i32
    scf.if %17 {
      %c0 = arith.constant 0 : index
      %c0_11 = arith.constant 0 : index
      %23 = vector.load %arg7[%c0, %c0_11] : memref<8x128xf32, #tpu.memory_space<vmem>>, vector<8x128xf32>
      %24 = vector.shape_cast %23 : vector<8x128xf32> to vector<1x8x128xf32>
      %cst = arith.constant dense<0.000000e+00> : vector<1xf32>
      %25 = vector.multi_reduction <add>, %24, %cst [1, 2] : vector<1x8x128xf32> to vector<1xf32>
      %26 = vector.shape_cast %25 : vector<1xf32> to vector<1x1x1xf32>
      %27 = vector.extract %26[0, 0, 0] : f32 from vector<1x1x1xf32>
      %cst_12 = arith.constant 0.001953125 : f32
      %28 = arith.mulf %27, %cst_12 : f32
      %c0_13 = arith.constant 0 : index
      %c0_14 = arith.constant 0 : index
      %29 = vector.load %arg5[%c0_13, %c0_14] : memref<1x128xf32, #tpu.memory_space<vmem>>, vector<1x128xf32>
      %c0_15 = arith.constant 0 : index
      %c0_16 = arith.constant 0 : index
      %30 = vector.load %arg4[%c0_15, %c0_16] : memref<1x128xf32, #tpu.memory_space<vmem>>, vector<1x128xf32>
      %31 = math.log %29 : vector<1x128xf32>
      %cst_17 = arith.constant -1.000000e+02 : f32
      %32 = vector.broadcast %cst_17 : f32 to vector<1x128xf32>
      %33 = arith.maximumf %31, %32 : vector<1x128xf32>
      %cst_18 = arith.constant 1.000000e+00 : f32
      %34 = vector.broadcast %cst_18 : f32 to vector<1x128xf32>
      %35 = arith.subf %34, %29 : vector<1x128xf32>
      %36 = math.log %35 : vector<1x128xf32>
      %cst_19 = arith.constant -1.000000e+02 : f32
      %37 = vector.broadcast %cst_19 : f32 to vector<1x128xf32>
      %38 = arith.maximumf %36, %37 : vector<1x128xf32>
      %39 = arith.mulf %30, %33 : vector<1x128xf32>
      %cst_20 = arith.constant 1.000000e+00 : f32
      %40 = vector.broadcast %cst_20 : f32 to vector<1x128xf32>
      %41 = arith.subf %40, %30 : vector<1x128xf32>
      %42 = arith.mulf %41, %38 : vector<1x128xf32>
      %43 = arith.addf %39, %42 : vector<1x128xf32>
      %cst_21 = arith.constant 0.000000e+00 : f32
      %44 = vector.broadcast %cst_21 : f32 to vector<1x128xf32>
      %45 = arith.subf %44, %43 : vector<1x128xf32>
      %46 = vector.shape_cast %45 : vector<1x128xf32> to vector<1x1x128xf32>
      %cst_22 = arith.constant dense<0.000000e+00> : vector<1xf32>
      %47 = vector.multi_reduction <add>, %46, %cst_22 [1, 2] : vector<1x1x128xf32> to vector<1xf32>
      %48 = vector.shape_cast %47 : vector<1xf32> to vector<1x1x1xf32>
      %49 = vector.extract %48[0, 0, 0] : f32 from vector<1x1x1xf32>
      %cst_23 = arith.constant 2.500000e-01 : f32
      %50 = arith.mulf %cst_23, %49 : f32
      %51 = arith.addf %28, %50 : f32
      %c0_24 = arith.constant 0 : index
      %c0_25 = arith.constant 0 : index
      %52 = memref.load %arg6[%c0_24, %c0_25] : memref<1x1xf32, #tpu.memory_space<smem>>
      memref.store %51, %arg6[%c0_24, %c0_25] : memref<1x1xf32, #tpu.memory_space<smem>>
    } else {
    }
    %c0_i32_8 = arith.constant 0 : i32
    %18 = arith.cmpi eq, %arg1, %c0_i32_8 : i32
    %c0_i32_9 = arith.constant 0 : i32
    %19 = arith.cmpi ne, %arg0, %c0_i32_9 : i32
    %20 = arith.andi %18, %19 : i1
    %21 = arith.extui %20 : i1 to i32
    %c0_i32_10 = arith.constant 0 : i32
    %22 = arith.cmpi ne, %21, %c0_i32_10 : i32
    scf.if %22 {
      %c0 = arith.constant 0 : index
      %c0_11 = arith.constant 0 : index
      %23 = vector.load %arg7[%c0, %c0_11] : memref<8x128xf32, #tpu.memory_space<vmem>>, vector<8x128xf32>
      %24 = vector.shape_cast %23 : vector<8x128xf32> to vector<1x8x128xf32>
      %cst = arith.constant dense<0.000000e+00> : vector<1xf32>
      %25 = vector.multi_reduction <add>, %24, %cst [1, 2] : vector<1x8x128xf32> to vector<1xf32>
      %26 = vector.shape_cast %25 : vector<1xf32> to vector<1x1x1xf32>
      %27 = vector.extract %26[0, 0, 0] : f32 from vector<1x1x1xf32>
      %cst_12 = arith.constant 0.001953125 : f32
      %28 = arith.mulf %27, %cst_12 : f32
      %c0_13 = arith.constant 0 : index
      %c0_14 = arith.constant 0 : index
      %29 = memref.load %arg6[%c0_13, %c0_14] : memref<1x1xf32, #tpu.memory_space<smem>>
      memref.store %28, %arg6[%c0_13, %c0_14] : memref<1x1xf32, #tpu.memory_space<smem>>
    } else {
    }
    return
  }
  func.func @transform_0(%arg0: i32, %arg1: i32) -> (i32, i32) {
    %c1_i32 = arith.constant 1 : i32
    %0 = arith.muli %arg0, %c1_i32 : i32
    %1 = arith.addi %0, %arg1 : i32
    %c0_i32 = arith.constant 0 : i32
    %2 = arith.minsi %1, %c0_i32 : i32
    %c0_i32_0 = arith.constant 0 : i32
    %c0_i32_1 = arith.constant 0 : i32
    return %2, %c0_i32_0 : i32, i32
  }
  func.func @transform_1(%arg0: i32, %arg1: i32) -> (i32, i32) {
    %c1_i32 = arith.constant 1 : i32
    %0 = arith.muli %arg0, %c1_i32 : i32
    %1 = arith.addi %0, %arg1 : i32
    %c0_i32 = arith.constant 0 : i32
    %2 = arith.minsi %1, %c0_i32 : i32
    %c0_i32_0 = arith.constant 0 : i32
    %c0_i32_1 = arith.constant 0 : i32
    return %2, %c0_i32_0 : i32, i32
  }
  func.func @transform_2(%arg0: i32, %arg1: i32) -> (i32, i32) {
    %c0_i32 = arith.constant 0 : i32
    %c0_i32_0 = arith.constant 0 : i32
    %c0_i32_1 = arith.constant 0 : i32
    return %c0_i32, %c0_i32_0 : i32, i32
  }
  func.func @transform_3(%arg0: i32, %arg1: i32) -> (i32, i32) {
    %c0_i32 = arith.constant 0 : i32
    %c0_i32_0 = arith.constant 0 : i32
    %c0_i32_1 = arith.constant 0 : i32
    return %c0_i32, %c0_i32_0 : i32, i32
  }
  func.func @transform_4(%arg0: i32, %arg1: i32) -> (i32, i32) {
    %c0_i32 = arith.constant 0 : i32
    %c0_i32_0 = arith.constant 0 : i32
    return %arg0, %c0_i32 : i32, i32
  }
}

</mosaic_0001>

<bundles_post_ra>
// kernel: tpu_custom_call.1
= control target key start
LH: loop header
LB: loop body
LE: loop exit
PB: predicated region body
PF: predicated region fallthrough
CT: control target
= control target key end

     0   :  { %9 = vsyncpa [#allocation4], 0  ;;  %s335_s0 = inlined_call_operand.hbm [shape: f32[4,128], index: 0, kind: input, shape index: {}]   ;;  %s336_s1 = inlined_call_operand.hbm [shape: f32[4,128], index: 1, kind: input, shape index: {}]   ;;  %s337_s2 = inlined_call_operand.vmem [shape: f32[1,128], index: 2, kind: input, shape index: {}]   ;;  %s338_s3 = inlined_call_operand.vmem [shape: f32[1,128], index: 3, kind: input, shape index: {}]   ;;  %s339_s4 = inlined_call_operand.hbm [shape: f32[1,1], index: 4, kind: output, shape index: {}]  }
   0x1   :  { %10 = vsyncpa [#allocation7], 0 }
   0x2   :  { %11 = vsyncpa [#allocation5], 0  ;;  %s264_s15 = smov [#allocation3]   ;;  %s265_s17 = smov [#allocation6]  }
   0x3   :  { %s23_s16 = sshll.u32 %s264_s15, 4  ;;  %s38_s18 = sshll.u32 %s265_s17, 4  ;;  %s24_s16 = int_to_ptr.vmem [resolvable:$true] %s23_s16  ;;  %s39_s18 = int_to_ptr.vmem [resolvable:$true] %s38_s18 }
   0x4   :  { %s204_s21 = scalar_lea.hbm %s335_s0, 64 }
   0x5   :  { %p205_p0 = scmp.ne.s32.totalorder %s335_s0, %s204_s21  ;;  %p208_p1 = scmp.lt.u32.totalorder %s204_s21, %s335_s0 }
   0x7   :  { %p210_p2 = pnand %p208_p1, %p205_p0 }
   0x9   :  { %213 = shalt.err (!%p210_p2)
}
   0xa   :  { %s214_s26 = scalar_lea.vmem %s24_s16, 64  ;;  %p219_p4 = scmp.lt.s32.totalorder %s24_s16, %s24_s16 }
   0xb   :  { %p215_p3 = scmp.ne.s32.totalorder %s24_s16, %s214_s26  ;;  %p220_p5 = scmp.lt.s32.totalorder %s214_s26, %s214_s26 }
   0xd   :  { %p221_p6 = por %p220_p5, %p219_p4 }
   0xf   :  { %p222_p7 = pnand %p221_p6, %p215_p3 }
  0x11   :  { %225 = shalt.err (!%p222_p7)
}
  0x12   :  { %26 = dma.hbm_to_vmem [thread:$0]  %s335_s0, 64, %s24_s16, [#allocation4]  }
  0x13   :  { %s226_s5 = scalar_lea.hbm %s336_s1, 64 }
  0x14   :  { %p227_p8 = scmp.ne.s32.totalorder %s336_s1, %s226_s5  ;;  %p230_p9 = scmp.lt.u32.totalorder %s226_s5, %s336_s1 }
  0x16   :  { %p232_p10 = pnand %p230_p9, %p227_p8 }
  0x18   :  { %235 = shalt.err (!%p232_p10)
}
  0x19   :  { %s236_s10 = scalar_lea.vmem %s39_s18, 64  ;;  %p241_p12 = scmp.lt.s32.totalorder %s39_s18, %s39_s18 }
  0x1a   :  { %p237_p11 = scmp.ne.s32.totalorder %s39_s18, %s236_s10  ;;  %p242_p13 = scmp.lt.s32.totalorder %s236_s10, %s236_s10 }
  0x1c   :  { %p243_p0 = por %p242_p13, %p241_p12 }
  0x1e   :  { %p244_p1 = pnand %p243_p0, %p237_p11 }
  0x20   :  { %247 = shalt.err (!%p244_p1)
}
  0x21   :  { %41 = dma.hbm_to_vmem [thread:$0]  %s336_s1, 64, %s39_s18, [#allocation7]  }
  0x22   :  { %258 = dma.done.wait [#allocation4], 64  }
  0x23   :  { %259 = vsyncadd [#allocation4], 4294967232 }
  0x24   :  { %260 = dma.done.wait [#allocation7], 64  }
  0x25   :  { %261 = vsyncadd [#allocation7], 4294967232  ;;  %v266_v0 = vmov 0.0   ;;  %v70_v1 = vld [vmem:[#allocation6] sm:$0xf]  ;;  %vm75_vm0 = vcmask 1043456  }
  0x26   :  { %62 = vst [vmem:[#allocation2] sm:$0xff] %v266_v0  ;;  %v71_v2 = vld [vmem:[#allocation3] sm:$0xf]  ;;  %v126_v3 = vld [vmem:[%s338_s3] sm:$0x1]  ;;  %vm140_vm1 = vcmask 1040384  }
  0x27   :  { %v72_v4 = vsub.f32 %v70_v1, %v71_v2  ;;  %200 = vlog2.f32 %v126_v3  ;;  %v131_v5 = vsub.f32 1.0, %v126_v3  ;;  %v127_v12 = vld [vmem:[%s337_s2] sm:$0x1]  ;;  %s248_s20 = scalar_lea.hbm %s339_s4, 16 }
  0x28   :  { %v136_v19 = vsub.f32 1.0, %v127_v12  ;;  %p249_p2 = scmp.ne.s32.totalorder %s339_s4, %s248_s20  ;;  %p252_p3 = scmp.lt.u32.totalorder %s248_s20, %s339_s4 }
  0x29   :  { %v73_v6 = vmul.f32 %v72_v4, %v72_v4  ;;  %202 = vlog2.f32 %v131_v5 }
  0x2a   :  { %p254_p4 = pnand %p252_p3, %p249_p2 }
  0x2b   :  { %v76_v7 = vsel %vm75_vm0, %v73_v6, 0.0 }
  0x2c   :  { %v77_v8 = vrot.slane %v76_v7, 4 }
  0x2d   :  { %v74_v20 = vld [vmem:[#allocation2] sm:$0x1] }
  0x2e   :  { %v78_v9 = vadd.f32 %v77_v8, %v76_v7 }
  0x30   :  { %v79_v10 = vrot.slane %v78_v9, 2 }
  0x31   :  { %v201_v11 = vpop.eup %200 }
  0x32   :  { %v80_v13 = vadd.f32 %v79_v10, %v78_v9  ;;  %v129_v14 = vmul.f32 0.6931472, %v201_v11 }
  0x33   :  { %v203_v15 = vpop.eup %202 }
  0x34   :  { %v81_v16 = vrot.slane %v80_v13, 1  ;;  %v130_v17 = vmax.f32 %v129_v14, -100.0  ;;  %v133_v18 = vmul.f32 0.6931472, %v203_v15 }
  0x36   :  { %v82_v21 = vadd.f32 %v81_v16, %v80_v13  ;;  %v134_v22 = vmax.f32 %v133_v18, -100.0  ;;  %v135_v23 = vmul.f32 %v130_v17, %v127_v12 }
  0x38   :  { %v83_v24 = vadd.f32 %v82_v21, %v74_v20  ;;  %v137_v25 = vmul.f32 %v136_v19, %v134_v22 }
  0x3a   :  { %84 = vst [vmem:[#allocation2] sm:$0x1] %v83_v24  ;;  %v138_v26 = vadd.f32 %v137_v25, %v135_v23 }
  0x3c   :  { %v139_v27 = vsub.f32 0.0, %v138_v26 }
  0x3e   :  { %v141_v29 = vsel %vm140_vm1, %v139_v27, 0.0 }
  0x41   :  { %v115_v28 = vld [vmem:[#allocation2] sm:$0xff] }
  0x42   :  { %116 = vadd.xlane.f32.xlu0 %v115_v28 }
  0x46   :  { %142 = vadd.xlane.f32.xlu0 %v141_v29 }
  0xcf   :  { %v117_v30 = vpop.xlane.xlu0 %116 }
  0xd0   :  { %v118_v31 = vrot.slane %v117_v30, 4 }
  0xd2   :  { %v119_v32 = vadd.f32 %v118_v31, %v117_v30 }
  0xd3   :  { %v143_v33 = vpop.xlane.xlu0 %142 }
  0xd4   :  { %v120_v34 = vrot.slane %v119_v32, 2  ;;  %v144_v35 = vrot.slane %v143_v33, 4 }
  0xd6   :  { %v145_v36 = vadd.f32 %v144_v35, %v143_v33  ;;  %v121_v37 = vadd.f32 %v120_v34, %v119_v32 }
  0xd8   :  { %v146_v38 = vrot.slane %v145_v36, 2  ;;  %v122_v39 = vrot.slane %v121_v37, 1 }
  0xda   :  { %v147_v40 = vadd.f32 %v146_v38, %v145_v36  ;;  %v123_v41 = vadd.f32 %v122_v39, %v121_v37 }
  0xdc   :  { %192 = vpush %v123_v41  ;;  %v148_v42 = vrot.slane %v147_v40, 1 }
  0xde   :  { %v149_v43 = vadd.f32 %v148_v42, %v147_v40 }
  0xe0   :  { %194 = vpush %v149_v43 }
 0x10d   :  { %s193_s2 = spop %192 }
 0x10e   :  { %s125_s3 = smul.f32 0.001953125, %s193_s2 }
 0x111   :  { %s195_s15 = spop %194 }
 0x112   :  { %s151_s16 = smul.f32 0.25, %s195_s15 }
 0x114   :  { %s152_s17 = sadd.f32 %s151_s16, %s125_s3 }
 0x116   :  { %154 = sst [smem:[#allocation8]] %s152_s17 }
 0x117   :  { %257 = shalt.err (!%p254_p4)
}
 0x118   :  { %s267_s25 = smov [#allocation8]  }
 0x119   :  { %180 = dma.smem_to_hbm %s267_s25, 16, %s339_s4, [#allocation5]  }
 0x11a   :  { %262 = dma.done.wait [#allocation5], 16  }
 0x11b   :  { %263 = vsyncadd [#allocation5], 4294967280 }
 0x11c   :  { %184 = sfence }
 0x11d   :  { %185 = vsyncpa [#allocation4], 1 }
 0x11e   :  { %186 = vsyncpa [#allocation7], 1 }
 0x11f   :  { %187 = vsyncpa [#allocation5], 1 }

</bundles_post_ra>
